<compile_context>
chip_gen: v6e
topology: v6e:2x2x1
jax: 0.10.0
libtpu: 0.0.40
codegen_flags: <defaults>
</compile_context>

<pallas_src>
import jax
import jax.numpy as jnp
from jax import lax
from jax.experimental import pallas as pl
from jax.experimental.pallas import tpu as pltpu


_LANE = 128      # TPU lane width
_SUBLANE = 8     # TPU sublane count
_TM_MAX = 512    # max M-tile (lanes) per grid step


def _ceil_div(a, b):
    return -(-a // b)


def _round_up(a, b):
    return _ceil_div(a, b) * b


def _choose_m_tiling(m):
    """Pick (tile_m, grid_m) for the lane-dense M axis.

    - tiles are multiples of 128 lanes, capped at _TM_MAX;
    - tiny problems (m <= 128) collapse to a single grid step (no pipeline);
    - larger problems get >= 2 balanced tiles so the 'parallel' grid axis can
      be sharded across v7x's two TensorCores (v5e/v6e: just extra cheap steps).
    """
    n_units = _ceil_div(m, _LANE)            # number of 128-lane chunks
    if n_units <= 1:
        return _LANE, 1
    grid_m = max(2, _ceil_div(n_units, _TM_MAX // _LANE))
    tile_m = _ceil_div(n_units, grid_m) * _LANE
    return tile_m, grid_m


def _matmul_bias_relu_kernel(w_ref, x_ref, b_ref, o_ref):
    """Fused conv-as-matmul + bias + ReLU (transposed layout, M lane-dense).

    w_ref: (Cout_pad, K_pad)   flattened conv weight (zero padded)
    x_ref: (K_pad, TM)         im2col patch columns for this M tile
    b_ref: (Cout_pad, 1)       bias (zero padded), lane-broadcast in kernel
    o_ref: (Cout_pad, TM)
    """
    acc = jnp.dot(w_ref[...], x_ref[...], preferred_element_type=jnp.float32)
    acc = acc + b_ref[...]                    # broadcast along lanes (M)
    o_ref[...] = jnp.maximum(acc, 0.0).astype(o_ref.dtype)


def conv2d_relu_pallas(x_nchw, w_oihw, bias, stride):
    """ReLU(Conv2d(x)) with valid padding; x is NCHW, weight is OIHW (PyTorch layout)."""
    n, c_in, h, w = x_nchw.shape
    c_out, _, k_h, k_w = w_oihw.shape
    h_out = (h - k_h) // stride + 1
    w_out = (w - k_w) // stride + 1

    # ---- wrapper-side layout glue (XLA) ------------------------------------
    x = jnp.transpose(x_nchw, (0, 2, 3, 1))                       # (N, H, W, Cin)

    # im2col once: taps ordered (kh, kw, ci) -> (N, HO, WO, KH*KW*Cin)
    taps = []
    for kh in range(k_h):
        for kw in range(k_w):
            taps.append(
                x[:, kh:kh + (h_out - 1) * stride + 1:stride,
                     kw:kw + (w_out - 1) * stride + 1:stride, :])
    patches = jnp.concatenate(taps, axis=-1)                      # (N, HO, WO, K)

    k_dim = k_h * k_w * c_in
    m = n * h_out * w_out

    # Transposed operand: K on sublanes, M on lanes (lane-dense output layout).
    patches_t = jnp.moveaxis(patches, -1, 0).reshape(k_dim, m)    # (K, M)

    # Matching weight layout: OIHW -> (Cout, KH, KW, Cin) -> (Cout, K)
    w_t = jnp.transpose(w_oihw, (0, 2, 3, 1)).reshape(c_out, k_dim)

    # Zero-pad: K/Cout only to sublane multiples (8), M to lane-dense tiles.
    tile_m, grid_m = _choose_m_tiling(m)
    m_pad = tile_m * grid_m
    k_pad = _round_up(k_dim, _SUBLANE)
    co_pad = _round_up(c_out, _SUBLANE)

    patches_t = jnp.pad(patches_t, ((0, k_pad - k_dim), (0, m_pad - m)))
    w_t = jnp.pad(w_t, ((0, co_pad - c_out), (0, k_pad - k_dim)))
    b_t = jnp.pad(bias.reshape(c_out, 1), ((0, co_pad - c_out), (0, 0)))

    # Real (unpadded) cost — helps XLA schedule surrounding pad/transpose ops.
    itemsize = jnp.dtype(x_nchw.dtype).itemsize
    cost = pl.CostEstimate(
        flops=2 * m * k_dim * c_out,
        transcendentals=0,
        bytes_accessed=(m * k_dim + k_dim * c_out + c_out + m * c_out) * itemsize,
    )

    out = pl.pallas_call(
        _matmul_bias_relu_kernel,
        out_shape=jax.ShapeDtypeStruct((co_pad, m_pad), x_nchw.dtype),
        grid=(grid_m,),
        in_specs=[
            pl.BlockSpec((co_pad, k_pad), lambda i: (0, 0)),   # weight, resident
            pl.BlockSpec((k_pad, tile_m), lambda i: (0, i)),   # patches M tile
            pl.BlockSpec((co_pad, 1), lambda i: (0, 0)),       # bias, resident
        ],
        out_specs=pl.BlockSpec((co_pad, tile_m), lambda i: (0, i)),
        compiler_params=pltpu.CompilerParams(
            dimension_semantics=("parallel",),   # M tiles shard across v7x's 2 TCs
            vmem_limit_bytes=32 * 1024 * 1024,
        ),
        cost_estimate=cost,
    )(w_t, patches_t, b_t)

    # Un-pad and restore PyTorch NCHW convention.
    out = out[:c_out, :m].reshape(c_out, n, h_out, w_out)
    return jnp.transpose(out, (1, 0, 2, 3))


def _reference(x_nchw, w_oihw, bias, stride):
    out = lax.conv_general_dilated(
        x_nchw, w_oihw, window_strides=(stride, stride), padding="VALID",
        dimension_numbers=("NCHW", "OIHW", "NCHW"))
    out = out + bias.reshape(1, -1, 1, 1)
    return jnp.maximum(out, 0.0)


if __name__ == "__main__":
    # Module configuration (synthetic, deterministic init — no checkpoint load).
    batch = 2
    number_of_input_channels = 4
    number_of_output_channels = 8
    kernel_size = 3
    stride_size = 2
    spatial = 16

    key = jax.random.PRNGKey(0)
    kx, kw, kb = jax.random.split(key, 3)

    x = jax.random.normal(
        kx, (batch, number_of_input_channels, spatial, spatial), dtype=jnp.float32)

    # Conv2d-style init: uniform in [-1/sqrt(fan_in), 1/sqrt(fan_in)].
    fan_in = number_of_input_channels * kernel_size * kernel_size
    bound = 1.0 / jnp.sqrt(jnp.float32(fan_in))
    weight = jax.random.uniform(
        kw, (number_of_output_channels, number_of_input_channels, kernel_size, kernel_size),
        minval=-bound, maxval=bound, dtype=jnp.float32)
    bias = jax.random.uniform(
        kb, (number_of_output_channels,), minval=-bound, maxval=bound, dtype=jnp.float32)

    y = conv2d_relu_pallas(x, weight, bias, stride_size)
    y = jax.block_until_ready(y)

    y_ref = _reference(x, weight, bias, stride_size)
    assert y.shape == y_ref.shape, (y.shape, y_ref.shape)
    assert jnp.allclose(y, y_ref, atol=1e-5, rtol=1e-5), "mismatch vs XLA conv reference"

    print("KERNEL_OK")
</pallas_src>

<mosaic_0001>
module attributes {stable_mosaic.version = 11 : i64} {
  func.func @_matmul_bias_relu_kernel(%arg0: i32, %arg1: memref<8x40xf32, #tpu.memory_space<vmem>>, %arg2: memref<40x128xf32, #tpu.memory_space<vmem>>, %arg3: memref<8x1xf32, #tpu.memory_space<vmem>>, %arg4: memref<8x128xf32, #tpu.memory_space<vmem>>) attributes {dimension_semantics = [#tpu.dimension_semantics<parallel>], iteration_bounds = array<i64: 1>, scalar_prefetch = 0 : i64, scratch_operands = 0 : i64, tpu.core_type = #tpu.core_type<tc>, window_params = [{pipeline_mode = #tpu.pipeline_mode<synchronous>, transform_indices = @transform_0, window_bounds = array<i64: 8, 40>}, {transform_indices = @transform_1, window_bounds = array<i64: 40, 128>}, {pipeline_mode = #tpu.pipeline_mode<synchronous>, transform_indices = @transform_2, window_bounds = array<i64: 8, 1>}, {transform_indices = @transform_3, window_bounds = array<i64: 8, 128>}]} {
    %c0 = arith.constant 0 : index
    %c0_0 = arith.constant 0 : index
    %0 = vector.load %arg1[%c0, %c0_0] : memref<8x40xf32, #tpu.memory_space<vmem>>, vector<8x40xf32>
    %c0_1 = arith.constant 0 : index
    %c0_2 = arith.constant 0 : index
    %1 = vector.load %arg2[%c0_1, %c0_2] : memref<40x128xf32, #tpu.memory_space<vmem>>, vector<40x128xf32>
    %cst = arith.constant dense<0.000000e+00> : vector<8x128xf32>
    %2 = tpu.matmul %0, %1, %cst {dimension_numbers = #tpu.dot_dimension_numbers<[1], [0], [0], [1], [0, 0, 1, 1], [], []>} : vector<8x40xf32>, vector<40x128xf32>, vector<8x128xf32> -> vector<8x128xf32>
    %c0_3 = arith.constant 0 : index
    %c0_4 = arith.constant 0 : index
    %3 = vector.load %arg3[%c0_3, %c0_4] : memref<8x1xf32, #tpu.memory_space<vmem>>, vector<8x1xf32>
    %4 = vector.broadcast %3 : vector<8x1xf32> to vector<8x128xf32>
    %5 = arith.addf %2, %4 : vector<8x128xf32>
    %cst_5 = arith.constant 0.000000e+00 : f32
    %6 = vector.broadcast %cst_5 : f32 to vector<8x128xf32>
    %7 = arith.maximumf %5, %6 : vector<8x128xf32>
    %c0_6 = arith.constant 0 : index
    %c0_7 = arith.constant 0 : index
    %8 = vector.load %arg4[%c0_6, %c0_7] : memref<8x128xf32, #tpu.memory_space<vmem>>, vector<8x128xf32>
    tpu.vector_store %arg4[%c0_6, %c0_7], %7 {strides = array<i32>} : memref<8x128xf32, #tpu.memory_space<vmem>>, vector<8x128xf32>,
    return
  }
  func.func @transform_0(%arg0: i32) -> (i32, i32) {
    %c0_i32 = arith.constant 0 : i32
    %c0_i32_0 = arith.constant 0 : i32
    %c0_i32_1 = arith.constant 0 : i32
    return %c0_i32, %c0_i32_0 : i32, i32
  }
  func.func @transform_1(%arg0: i32) -> (i32, i32) {
    %c0_i32 = arith.constant 0 : i32
    %c0_i32_0 = arith.constant 0 : i32
    return %c0_i32, %arg0 : i32, i32
  }
  func.func @transform_2(%arg0: i32) -> (i32, i32) {
    %c0_i32 = arith.constant 0 : i32
    %c0_i32_0 = arith.constant 0 : i32
    %c0_i32_1 = arith.constant 0 : i32
    return %c0_i32, %c0_i32_0 : i32, i32
  }
  func.func @transform_3(%arg0: i32) -> (i32, i32) {
    %c0_i32 = arith.constant 0 : i32
    %c0_i32_0 = arith.constant 0 : i32
    return %c0_i32, %arg0 : i32, i32
  }
}

</mosaic_0001>

<bundles_post_ra>
// kernel: tpu_custom_call.1
= control target key start
LH: loop header
LB: loop body
LE: loop exit
PB: predicated region body
PF: predicated region fallthrough
CT: control target
= control target key end

     0   :  { %8 = vsyncpa [#allocation3], 0  ;;  %s243_s0 = inlined_call_operand.vmem [shape: f32[8,40], index: 0, kind: input, shape index: {}]   ;;  %s244_s1 = inlined_call_operand.hbm [shape: f32[40,128], index: 1, kind: input, shape index: {}]   ;;  %s245_s2 = inlined_call_operand.vmem [shape: f32[8,1], index: 2, kind: input, shape index: {}]   ;;  %s246_s3 = inlined_call_operand.hbm [shape: f32[8,128], index: 3, kind: output, shape index: {}]  }
   0x1   :  { %9 = vsyncpa [#allocation4], 0  ;;  %s204_s12 = smov [#allocation2]  }
   0x2   :  { %s17_s13 = sshll.u32 %s204_s12, 4  ;;  %s18_s13 = int_to_ptr.vmem [resolvable:$true] %s17_s13 }
   0x3   :  { %s168_s14 = scalar_lea.vmem %s18_s13, 640  ;;  %p173_p1 = scmp.lt.s32.totalorder %s18_s13, %s18_s13 }
   0x4   :  { %p169_p0 = scmp.ne.s32.totalorder %s18_s13, %s168_s14  ;;  %p174_p2 = scmp.lt.s32.totalorder %s168_s14, %s168_s14 }
   0x6   :  { %p175_p3 = por %p174_p2, %p173_p1 }
   0x8   :  { %p176_p4 = pnand %p175_p3, %p169_p0 }
   0xa   :  { %179 = shalt.err (!%p176_p4)
}
   0xb   :  { %s205_s15 = smov 128   ;;  %s206_s16 = smov 8  }
   0xc   :  { %23 = dma.hbm_to_vmem [thread:$0]  %s244_s1, 640, %s18_s13, [#allocation3], %s205_s15, %s205_s15, %s206_s16  }
   0xd   :  { %200 = dma.done.wait [#allocation3], 640  }
   0xe   :  { %201 = vsyncadd [#allocation3], 4294966656  ;;  %v207_v0 = vmov 0.0   ;;  %vm208_vm0 = vmmov 0   ;;  %v209_v1 = vmov 0   ;;  %v34_v2 = vld [vmem:[#allocation2 + $0x20] sm:$0xff] }
   0xf   :  { %139 = vmatprep.subr.mxu0 %v207_v0  ;;  %149 = vmatprep.mubr.msk.f32.mxu0 %vm208_vm0, %v207_v0  ;;  %v33_v3 = vld [vmem:[#allocation2 + $0x18] sm:$0xff]  ;;  %v32_v4 = vld [vmem:[#allocation2 + $0x10] sm:$0xff]  ;;  %v35_v5 = vld [vmem:[%s245_s2] sm:$0xff]  ;;  %vm41_vm1 = vcmask 326656   ;;  %s210_s22 = smov [#allocation5]  }
  0x10   :  { %159 = vset.pattern.permute.xlu0 %v209_v1  ;;  %140 = vmatpush3.msra.mxu0 %v34_v2  ;;  %v31_v6 = vld [vmem:[#allocation2 + $0x8] sm:$0xff]  ;;  %v30_v7 = vld [vmem:[#allocation2] sm:$0xff]  ;;  %s123_s2 = sshll.u32 %s210_s22, 4  ;;  %s124_s2 = int_to_ptr.vmem [resolvable:$true] %s123_s2 }
  0x11   :  { %141 = vmatprep.subr.mxu0 %v207_v0  ;;  %38 = vperm.xlu0 %159, %v35_v5   ;;  %v29_v8 = vld [vmem:[%s243_s0] sm:$0xff]  ;;  %s180_s23 = scalar_lea.vmem %s124_s2, 128  ;;  %p185_p6 = scmp.lt.s32.totalorder %s124_s2, %s124_s2 }
  0x12   :  { %142 = vmatpush3.msra.mxu0 %v33_v3  ;;  %p181_p5 = scmp.ne.s32.totalorder %s124_s2, %s180_s23  ;;  %p186_p7 = scmp.lt.s32.totalorder %s180_s23, %s180_s23 }
  0x13   :  { %143 = vmatprep.subr.mxu0 %v207_v0 }
  0x14   :  { %144 = vmatpush3.msra.mxu0 %v32_v4  ;;  %p187_p8 = por %p186_p7, %p185_p6 }
  0x15   :  { %145 = vmatprep.subr.mxu0 %v207_v0 }
  0x16   :  { %146 = vmatpush3.msra.mxu0 %v31_v6  ;;  %p188_p9 = pnand %p187_p8, %p181_p5 }
  0x17   :  { %147 = vmatprep.subr.mxu0 %v207_v0 }
  0x18   :  { %148 = vmatpush3.msra.mxu0 %v30_v7 }
  0x19   :  { %150 = vmatmul.mubr.msk.f32.vlgmr.msra.gmra.mxu0 %vm41_vm1, %v29_v8 }
  0x8c   :  { %v39_v9 = vpop.permute.xlu0 %38 }
  0xd9   :  { %v111_v10 = vpop.f32.mrf.mxu0 }
  0xda   :  { %v112_v11 = vadd.f32 %v111_v10, %v39_v9 }
  0xdb   :  { %v151_v12 = vpop.f32.mrf.mxu0 }
  0xdc   :  { %v115_v13 = vmax.f32 %v112_v11, 0.0 }
  0xde   :  { %116 = vst [vmem:[#allocation5] sm:$0xff] %v115_v13 }
  0xdf   :  { %191 = shalt.err (!%p188_p9)
}
  0xe0   :  { %126 = dma.vmem_to_hbm [thread:$0]  %s124_s2, 128, %s246_s3, [#allocation4]  }
  0xe1   :  { %202 = dma.done.wait [#allocation4], 128  }
  0xe2   :  { %203 = vsyncadd [#allocation4], 4294967168 }
  0xe3   :  { %130 = vsyncpa [#allocation3], 1 }
  0xe4   :  { %131 = vsyncpa [#allocation4], 1 }

</bundles_post_ra>
